<compile_context>
chip_gen: v7x
topology: tpu7x:2x2x1
jax: 0.10.0
libtpu: 0.0.40
codegen_flags: <defaults>
</compile_context>

<pallas_src>
import math

import jax
import jax.numpy as jnp
from jax import lax
from jax.experimental import pallas as pl
from jax.experimental.pallas import tpu as pltpu


def self_attention_kernel(hq_ref, k_ref, vl_ref, wqt_ref, lb_ref, o_ref):
    cdt = hq_ref.dtype                      # MXU compute dtype (bf16 or f32)

    # Query projection for this tile: native [tq, D_in] @ [D_in, H] MXU matmul.
    # The 1/sqrt(H) score scale is already folded into wqt by the wrapper.
    q = jnp.dot(hq_ref[...], wqt_ref[...], preferred_element_type=cdt)      # [tq, H]

    # Scores kept transposed: zt[j, i] = <k_j, q_i> / sqrt(H)  -> [Nkv, tq].
    # (softmax over the key axis == axis 0 here == dim=1 of the reference z)
    zt = lax.dot_general(k_ref[...], q, (((1,), (1,)), ((), ())),
                         preferred_element_type=jnp.float32)                # [Nkv, tq]

    # Numerically stable softmax with the normalization deferred past the reduction:
    #   y_i = (sum_j vl_j * e_ji) / (sum_j e_ji)
    # so the normalized beta matrix is never materialized.
    m = jnp.max(zt, axis=0, keepdims=True)                                  # [1, tq]
    e = jnp.exp(zt - m)                                                     # [Nkv, tq] f32
    s = jnp.sum(e, axis=0, keepdims=True)                                   # [1, tq]
    num = jnp.sum(vl_ref[...] * e, axis=0, keepdims=True)                   # [1, tq]
    yt = num * pl.reciprocal(s, approx=True) + lb_ref[0]                    # [1, tq]

    # NOTE: when N % block_q != 0, the padded query rows of this tile can produce
    # inf/NaN in the padded *lanes* of zt/e/yt only; all reductions here are over the
    # key axis (axis 0), so valid lanes are unaffected and the padded output lanes are
    # sliced away by the caller.

    # Final sigmoid: exact divide (tiny [1, tq] slab, negligible cost).
    o_ref[...] = 1.0 / (1.0 + jnp.exp(-yt))


def self_attention(h, wq, wk, wv, ln_w, ln_b, *,
                   compute_dtype=jnp.bfloat16, block_q=None):
    """h: [N, D_in]; wq/wk/wv: [H, D_in] (PyTorch layout); ln_w: [1, H]; ln_b: [1].

    Returns sigmoid(ln(softmax(q k^T / sqrt(H)) v)) as a [N] vector.
    """
    n, d_in = h.shape
    hid = wq.shape[0]
    scale = 1.0 / math.sqrt(hid)

    # ---- one-time parameter prep (in a real model: done once at init, not per call) --
    # Pre-transposed, pre-scaled query weight: the in-kernel q projection becomes a
    # native [M,K]@[K,N] matmul and the 1/sqrt(H) score scale rides along for free.
    wqt = (wq.T * scale).astype(compute_dtype)                              # [D_in, H]

    # ---- per-call prologue (plain XLA, runs once; NOT recomputed per query tile) ----
    hc = h.astype(compute_dtype)
    k = jnp.dot(hc, wk.T.astype(compute_dtype),
                preferred_element_type=jnp.float32).astype(compute_dtype)   # [N, H]
    v = jnp.dot(hc, wv.T.astype(compute_dtype),
                preferred_element_type=jnp.float32)                         # [N, H] f32
    # Reassociated output projection: (beta @ v) @ ln_w^T == beta @ (v @ ln_w^T).
    vl = jnp.dot(v, ln_w.T.astype(jnp.float32),
                 preferred_element_type=jnp.float32)                        # [N, 1] f32
    lb = ln_b.reshape((1,)).astype(jnp.float32)                             # SMEM scalar
    hq = hc                                                                 # query rows

    # ---- tiling heuristics -----------------------------------------------------------
    if block_q is None:
        if n <= 128:
            block_q = n                    # tiny N: single full tile
        elif n <= 256 and n % 128 == 0:
            block_q = 128                  # >=2 tiles so both v7x TensorCores get work
        elif n <= 256:
            block_q = n
        elif n >= 8192:
            block_q = 128                  # cap f32 [N, block_q] temporaries (v7x 64 MiB)
        else:
            block_q = 256
    grid = (pl.cdiv(n, block_q),)

    # VMEM budget: ~75% of the chip's capacity (~48 MiB on v7x, ~96 MiB on v5e/v6e).
    try:
        vmem_cap = int(getattr(pltpu.get_tpu_info(), "vmem_capacity_bytes",
                               64 * 1024 * 1024))
    except Exception:
        vmem_cap = 64 * 1024 * 1024
    vmem_limit = min(int(vmem_cap * 3 // 4), 100 * 1024 * 1024)

    def make_call(invariant_pipeline_mode):
        inv_kwargs = {}
        if invariant_pipeline_mode is not None:
            inv_kwargs["pipeline_mode"] = invariant_pipeline_mode
        return pl.pallas_call(
            self_attention_kernel,
            out_shape=jax.ShapeDtypeStruct((1, n), jnp.float32),  # lane-dense output slab
            grid=grid,
            in_specs=[
                pl.BlockSpec((block_q, d_in), lambda i: (i, 0)),            # query rows (tiled)
                pl.BlockSpec((n, hid), lambda i: (0, 0), **inv_kwargs),     # k, resident
                pl.BlockSpec((n, 1), lambda i: (0, 0), **inv_kwargs),       # v @ ln_w^T, resident
                pl.BlockSpec((d_in, hid), lambda i: (0, 0), **inv_kwargs),  # scaled wq^T
                pl.BlockSpec(memory_space=pltpu.MemorySpace.SMEM),          # ln bias (scalar)
            ],
            out_specs=pl.BlockSpec((1, block_q), lambda i: (0, i)),
            compiler_params=pltpu.CompilerParams(
                dimension_semantics=("parallel",),   # v7x: shard query tiles over 2 TCs
                vmem_limit_bytes=vmem_limit,
            ),
        )

    try:
        # Single-buffer the grid-invariant blocks (their index_map never changes).
        out = make_call(pl.Buffered(1))(hq, k, vl, wqt, lb)
    except Exception:
        # Fallback for JAX versions that reject pipeline_mode/Buffered(1):
        # default double-buffering of the small invariant blocks is only a VMEM cost.
        out = make_call(None)(hq, k, vl, wqt, lb)

    return out[0]                                     # matches y_res.squeeze(1) -> [N]


def reference(h, wq, wk, wv, ln_w, ln_b):
    q = h @ wq.T
    k = h @ wk.T
    v = h @ wv.T
    z = (q @ k.T) / math.sqrt(q.shape[-1])
    beta = jax.nn.softmax(z, axis=1)
    st = beta @ v
    y = st @ ln_w.T + ln_b
    return jax.nn.sigmoid(y[:, 0])


if __name__ == "__main__":
    # Small shapes: seq N=8, last_hidden_size=32, hidden_size=32
    N, D_IN, HID = 8, 32, 32

    key = jax.random.PRNGKey(0)
    k_h, k_q, k_k, k_v, k_l, k_b = jax.random.split(key, 6)

    h = jax.random.normal(k_h, (N, D_IN), dtype=jnp.float32)
    # Deterministic parameter init (synthetic, ~Linear-style scale)
    wq = jax.random.normal(k_q, (HID, D_IN), dtype=jnp.float32) / math.sqrt(D_IN)
    wk = jax.random.normal(k_k, (HID, D_IN), dtype=jnp.float32) / math.sqrt(D_IN)
    wv = jax.random.normal(k_v, (HID, D_IN), dtype=jnp.float32) / math.sqrt(D_IN)
    ln_w = jax.random.normal(k_l, (1, HID), dtype=jnp.float32) / math.sqrt(HID)
    ln_b = jax.random.normal(k_b, (1,), dtype=jnp.float32)

    y_ref = reference(h, wq, wk, wv, ln_w, ln_b)

    # f32 MXU path: accuracy check with tight tolerance.
    y_f32 = jax.block_until_ready(
        self_attention(h, wq, wk, wv, ln_w, ln_b, compute_dtype=jnp.float32))
    assert y_f32.shape == (N,)
    assert jnp.allclose(y_f32, y_ref, atol=2e-3, rtol=2e-3), (y_f32, y_ref)

    # bf16 MXU path (default on all chips): f32 accumulation & softmax, relaxed tolerance.
    y_bf16 = jax.block_until_ready(self_attention(h, wq, wk, wv, ln_w, ln_b))
    assert y_bf16.shape == (N,)
    assert jnp.allclose(y_bf16, y_ref, atol=3e-2, rtol=3e-2), (y_bf16, y_ref)

    print("KERNEL_OK")
</pallas_src>

<mosaic_0001>
module attributes {stable_mosaic.version = 11 : i64} {
  func.func @self_attention_kernel(%arg0: i32, %arg1: memref<8x32xf32, #tpu.memory_space<vmem>>, %arg2: memref<8x32xf32, #tpu.memory_space<vmem>>, %arg3: memref<8x1xf32, #tpu.memory_space<vmem>>, %arg4: memref<32x32xf32, #tpu.memory_space<vmem>>, %arg5: memref<1xf32, #tpu.memory_space<smem>>, %arg6: memref<1x8xf32, #tpu.memory_space<vmem>>) attributes {dimension_semantics = [#tpu.dimension_semantics<parallel>], iteration_bounds = array<i64: 1>, scalar_prefetch = 0 : i64, scratch_operands = 0 : i64, tpu.core_type = #tpu.core_type<tc>, window_params = [{transform_indices = @transform_0, window_bounds = array<i64: 8, 32>}, {pipeline_mode = #tpu.pipeline_mode<synchronous>, transform_indices = @transform_1, window_bounds = array<i64: 8, 32>}, {pipeline_mode = #tpu.pipeline_mode<synchronous>, transform_indices = @transform_2, window_bounds = array<i64: 8, 1>}, {pipeline_mode = #tpu.pipeline_mode<synchronous>, transform_indices = @transform_3, window_bounds = array<i64: 32, 32>}, {transform_indices = @transform_4, window_bounds = array<i64: 1>}, {transform_indices = @transform_5, window_bounds = array<i64: 1, 8>}]} {
    %c0 = arith.constant 0 : index
    %c0_0 = arith.constant 0 : index
    %0 = vector.load %arg1[%c0, %c0_0] : memref<8x32xf32, #tpu.memory_space<vmem>>, vector<8x32xf32>
    %c0_1 = arith.constant 0 : index
    %c0_2 = arith.constant 0 : index
    %1 = vector.load %arg4[%c0_1, %c0_2] : memref<32x32xf32, #tpu.memory_space<vmem>>, vector<32x32xf32>
    %cst = arith.constant dense<0.000000e+00> : vector<8x32xf32>
    %2 = tpu.matmul %0, %1, %cst {dimension_numbers = #tpu.dot_dimension_numbers<[1], [0], [0], [1], [0, 0, 1, 1], [], []>} : vector<8x32xf32>, vector<32x32xf32>, vector<8x32xf32> -> vector<8x32xf32>
    %c0_3 = arith.constant 0 : index
    %c0_4 = arith.constant 0 : index
    %3 = vector.load %arg2[%c0_3, %c0_4] : memref<8x32xf32, #tpu.memory_space<vmem>>, vector<8x32xf32>
    %cst_5 = arith.constant dense<0.000000e+00> : vector<8x8xf32>
    %4 = tpu.matmul %3, %2, %cst_5 {dimension_numbers = #tpu.dot_dimension_numbers<[1], [1], [0], [0], [0, 0, 1, 0], [], []>} : vector<8x32xf32>, vector<8x32xf32>, vector<8x8xf32> -> vector<8x8xf32>
    %cst_6 = arith.constant dense<0xFF800000> : vector<8xf32>
    %5 = vector.multi_reduction <maximumf>, %4, %cst_6 [0] : vector<8x8xf32> to vector<8xf32>
    %6 = vector.shape_cast %5 : vector<8xf32> to vector<1x8xf32>
    %7 = vector.broadcast %6 : vector<1x8xf32> to vector<8x8xf32>
    %8 = arith.subf %4, %7 : vector<8x8xf32>
    %9 = math.exp %8 : vector<8x8xf32>
    %cst_7 = arith.constant dense<0.000000e+00> : vector<8xf32>
    %10 = vector.multi_reduction <add>, %9, %cst_7 [0] : vector<8x8xf32> to vector<8xf32>
    %11 = vector.shape_cast %10 : vector<8xf32> to vector<1x8xf32>
    %c0_8 = arith.constant 0 : index
    %c0_9 = arith.constant 0 : index
    %12 = vector.load %arg3[%c0_8, %c0_9] : memref<8x1xf32, #tpu.memory_space<vmem>>, vector<8x1xf32>
    %13 = vector.broadcast %12 : vector<8x1xf32> to vector<8x8xf32>
    %14 = arith.mulf %13, %9 : vector<8x8xf32>
    %cst_10 = arith.constant dense<0.000000e+00> : vector<8xf32>
    %15 = vector.multi_reduction <add>, %14, %cst_10 [0] : vector<8x8xf32> to vector<8xf32>
    %16 = vector.shape_cast %15 : vector<8xf32> to vector<1x8xf32>
    %17 = tpu.reciprocal %11 {approx = true} : vector<1x8xf32> -> vector<1x8xf32>
    %18 = arith.mulf %16, %17 : vector<1x8xf32>
    %c0_11 = arith.constant 0 : index
    %19 = memref.load %arg5[%c0_11] : memref<1xf32, #tpu.memory_space<smem>>
    %20 = vector.broadcast %19 : f32 to vector<1x8xf32>
    %21 = arith.addf %18, %20 : vector<1x8xf32>
    %cst_12 = arith.constant 0.000000e+00 : f32
    %22 = vector.broadcast %cst_12 : f32 to vector<1x8xf32>
    %23 = arith.subf %22, %21 : vector<1x8xf32>
    %24 = math.exp %23 : vector<1x8xf32>
    %cst_13 = arith.constant 1.000000e+00 : f32
    %25 = vector.broadcast %cst_13 : f32 to vector<1x8xf32>
    %26 = arith.addf %25, %24 : vector<1x8xf32>
    %cst_14 = arith.constant 1.000000e+00 : f32
    %27 = vector.broadcast %cst_14 : f32 to vector<1x8xf32>
    %28 = arith.divf %27, %26 : vector<1x8xf32>
    %c0_15 = arith.constant 0 : index
    %c0_16 = arith.constant 0 : index
    %29 = vector.load %arg6[%c0_15, %c0_16] : memref<1x8xf32, #tpu.memory_space<vmem>>, vector<1x8xf32>
    tpu.vector_store %arg6[%c0_15, %c0_16], %28 {strides = array<i32>} : memref<1x8xf32, #tpu.memory_space<vmem>>, vector<1x8xf32>,
    return
  }
  func.func @transform_0(%arg0: i32) -> (i32, i32) {
    %c0_i32 = arith.constant 0 : i32
    %c0_i32_0 = arith.constant 0 : i32
    return %arg0, %c0_i32 : i32, i32
  }
  func.func @transform_1(%arg0: i32) -> (i32, i32) {
    %c0_i32 = arith.constant 0 : i32
    %c0_i32_0 = arith.constant 0 : i32
    %c0_i32_1 = arith.constant 0 : i32
    return %c0_i32, %c0_i32_0 : i32, i32
  }
  func.func @transform_2(%arg0: i32) -> (i32, i32) {
    %c0_i32 = arith.constant 0 : i32
    %c0_i32_0 = arith.constant 0 : i32
    %c0_i32_1 = arith.constant 0 : i32
    return %c0_i32, %c0_i32_0 : i32, i32
  }
  func.func @transform_3(%arg0: i32) -> (i32, i32) {
    %c0_i32 = arith.constant 0 : i32
    %c0_i32_0 = arith.constant 0 : i32
    %c0_i32_1 = arith.constant 0 : i32
    return %c0_i32, %c0_i32_0 : i32, i32
  }
  func.func @transform_4(%arg0: i32) -> i32 {
    %c0_i32 = arith.constant 0 : i32
    %c0_i32_0 = arith.constant 0 : i32
    return %c0_i32 : i32
  }
  func.func @transform_5(%arg0: i32) -> (i32, i32) {
    %c0_i32 = arith.constant 0 : i32
    %c0_i32_0 = arith.constant 0 : i32
    return %c0_i32, %arg0 : i32, i32
  }
}

module attributes {stable_mosaic.version = 11 : i64} {
  func.func @self_attention_kernel(%arg0: i32, %arg1: memref<8x32xf32, #tpu.memory_space<vmem>>, %arg2: memref<8x32xf32, #tpu.memory_space<vmem>>, %arg3: memref<8x1xf32, #tpu.memory_space<vmem>>, %arg4: memref<32x32xf32, #tpu.memory_space<vmem>>, %arg5: memref<1xf32, #tpu.memory_space<smem>>, %arg6: memref<1x8xf32, #tpu.memory_space<vmem>>) attributes {dimension_semantics = [#tpu.dimension_semantics<parallel>], iteration_bounds = array<i64: 1>, scalar_prefetch = 0 : i64, scratch_operands = 0 : i64, tpu.core_type = #tpu.core_type<tc>, window_params = [{transform_indices = @transform_0, window_bounds = array<i64: 8, 32>}, {pipeline_mode = #tpu.pipeline_mode<synchronous>, transform_indices = @transform_1, window_bounds = array<i64: 8, 32>}, {pipeline_mode = #tpu.pipeline_mode<synchronous>, transform_indices = @transform_2, window_bounds = array<i64: 8, 1>}, {pipeline_mode = #tpu.pipeline_mode<synchronous>, transform_indices = @transform_3, window_bounds = array<i64: 32, 32>}, {transform_indices = @transform_4, window_bounds = array<i64: 1>}, {transform_indices = @transform_5, window_bounds = array<i64: 1, 8>}]} {
    %c0 = arith.constant 0 : index
    %c0_0 = arith.constant 0 : index
    %0 = vector.load %arg1[%c0, %c0_0] : memref<8x32xf32, #tpu.memory_space<vmem>>, vector<8x32xf32>
    %c0_1 = arith.constant 0 : index
    %c0_2 = arith.constant 0 : index
    %1 = vector.load %arg4[%c0_1, %c0_2] : memref<32x32xf32, #tpu.memory_space<vmem>>, vector<32x32xf32>
    %cst = arith.constant dense<0.000000e+00> : vector<8x32xf32>
    %2 = tpu.matmul %0, %1, %cst {dimension_numbers = #tpu.dot_dimension_numbers<[1], [0], [0], [1], [0, 0, 1, 1], [], []>} : vector<8x32xf32>, vector<32x32xf32>, vector<8x32xf32> -> vector<8x32xf32>
    %c0_3 = arith.constant 0 : index
    %c0_4 = arith.constant 0 : index
    %3 = vector.load %arg2[%c0_3, %c0_4] : memref<8x32xf32, #tpu.memory_space<vmem>>, vector<8x32xf32>
    %cst_5 = arith.constant dense<0.000000e+00> : vector<8x8xf32>
    %4 = tpu.matmul %3, %2, %cst_5 {dimension_numbers = #tpu.dot_dimension_numbers<[1], [1], [0], [0], [0, 0, 1, 0], [], []>} : vector<8x32xf32>, vector<8x32xf32>, vector<8x8xf32> -> vector<8x8xf32>
    %cst_6 = arith.constant dense<0xFF800000> : vector<8xf32>
    %5 = vector.multi_reduction <maximumf>, %4, %cst_6 [0] : vector<8x8xf32> to vector<8xf32>
    %6 = vector.shape_cast %5 : vector<8xf32> to vector<1x8xf32>
    %7 = vector.broadcast %6 : vector<1x8xf32> to vector<8x8xf32>
    %8 = arith.subf %4, %7 : vector<8x8xf32>
    %9 = math.exp %8 : vector<8x8xf32>
    %cst_7 = arith.constant dense<0.000000e+00> : vector<8xf32>
    %10 = vector.multi_reduction <add>, %9, %cst_7 [0] : vector<8x8xf32> to vector<8xf32>
    %11 = vector.shape_cast %10 : vector<8xf32> to vector<1x8xf32>
    %c0_8 = arith.constant 0 : index
    %c0_9 = arith.constant 0 : index
    %12 = vector.load %arg3[%c0_8, %c0_9] : memref<8x1xf32, #tpu.memory_space<vmem>>, vector<8x1xf32>
    %13 = vector.broadcast %12 : vector<8x1xf32> to vector<8x8xf32>
    %14 = arith.mulf %13, %9 : vector<8x8xf32>
    %cst_10 = arith.constant dense<0.000000e+00> : vector<8xf32>
    %15 = vector.multi_reduction <add>, %14, %cst_10 [0] : vector<8x8xf32> to vector<8xf32>
    %16 = vector.shape_cast %15 : vector<8xf32> to vector<1x8xf32>
    %17 = tpu.reciprocal %11 {approx = true} : vector<1x8xf32> -> vector<1x8xf32>
    %18 = arith.mulf %16, %17 : vector<1x8xf32>
    %c0_11 = arith.constant 0 : index
    %19 = memref.load %arg5[%c0_11] : memref<1xf32, #tpu.memory_space<smem>>
    %20 = vector.broadcast %19 : f32 to vector<1x8xf32>
    %21 = arith.addf %18, %20 : vector<1x8xf32>
    %cst_12 = arith.constant 0.000000e+00 : f32
    %22 = vector.broadcast %cst_12 : f32 to vector<1x8xf32>
    %23 = arith.subf %22, %21 : vector<1x8xf32>
    %24 = math.exp %23 : vector<1x8xf32>
    %cst_13 = arith.constant 1.000000e+00 : f32
    %25 = vector.broadcast %cst_13 : f32 to vector<1x8xf32>
    %26 = arith.addf %25, %24 : vector<1x8xf32>
    %cst_14 = arith.constant 1.000000e+00 : f32
    %27 = vector.broadcast %cst_14 : f32 to vector<1x8xf32>
    %28 = arith.divf %27, %26 : vector<1x8xf32>
    %c0_15 = arith.constant 0 : index
    %c0_16 = arith.constant 0 : index
    %29 = vector.load %arg6[%c0_15, %c0_16] : memref<1x8xf32, #tpu.memory_space<vmem>>, vector<1x8xf32>
    tpu.vector_store %arg6[%c0_15, %c0_16], %28 {strides = array<i32>} : memref<1x8xf32, #tpu.memory_space<vmem>>, vector<1x8xf32>,
    return
  }
  func.func @transform_0(%arg0: i32) -> (i32, i32) {
    %c0_i32 = arith.constant 0 : i32
    %c0_i32_0 = arith.constant 0 : i32
    return %arg0, %c0_i32 : i32, i32
  }
  func.func @transform_1(%arg0: i32) -> (i32, i32) {
    %c0_i32 = arith.constant 0 : i32
    %c0_i32_0 = arith.constant 0 : i32
    %c0_i32_1 = arith.constant 0 : i32
    return %c0_i32, %c0_i32_0 : i32, i32
  }
  func.func @transform_2(%arg0: i32) -> (i32, i32) {
    %c0_i32 = arith.constant 0 : i32
    %c0_i32_0 = arith.constant 0 : i32
    %c0_i32_1 = arith.constant 0 : i32
    return %c0_i32, %c0_i32_0 : i32, i32
  }
  func.func @transform_3(%arg0: i32) -> (i32, i32) {
    %c0_i32 = arith.constant 0 : i32
    %c0_i32_0 = arith.constant 0 : i32
    %c0_i32_1 = arith.constant 0 : i32
    return %c0_i32, %c0_i32_0 : i32, i32
  }
  func.func @transform_4(%arg0: i32) -> i32 {
    %c0_i32 = arith.constant 0 : i32
    %c0_i32_0 = arith.constant 0 : i32
    return %c0_i32 : i32
  }
  func.func @transform_5(%arg0: i32) -> (i32, i32) {
    %c0_i32 = arith.constant 0 : i32
    %c0_i32_0 = arith.constant 0 : i32
    return %c0_i32, %arg0 : i32, i32
  }
}

</mosaic_0001>

<bundles_post_ra>
// kernel: tpu_custom_call.1
= control target key start
LH: loop header
LB: loop body
LE: loop exit
PB: predicated region body
PF: predicated region fallthrough
CT: control target
= control target key end

     0   :  { %11 = vsyncpa [#allocation4], 0  ;;  %s426_s0 = inlined_call_operand.vmem [shape: f32[8,32], index: 0, kind: input, shape index: {}]   ;;  %s427_s1 = inlined_call_operand.vmem [shape: f32[8,32], index: 1, kind: input, shape index: {}]   ;;  %s428_s2 = inlined_call_operand.vmem [shape: f32[8,1], index: 2, kind: input, shape index: {}]   ;;  %s429_s3 = inlined_call_operand.hbm [shape: f32[32,32], index: 3, kind: input, shape index: {}]   ;;  %s430_s4 = inlined_call_operand.<no memory space> [shape: f32[1], index: 4, kind: input, shape index: {}]   ;;  %s431_s5 = inlined_call_operand.hbm [shape: f32[1,8], index: 5, kind: output, shape index: {}]  }
   0x1   :  { %12 = vsyncpa [#allocation5], 0  ;;  %s349_s18 = smov [#allocation3]   ;;  %s301_s22 = scalar_lea.hbm %s429_s3, 512 }
   0x2   :  { %s24_s19 = sshll.u32 %s349_s18, 4  ;;  %p302_p0 = scmp.ne.s32.totalorder %s429_s3, %s301_s22  ;;  %s25_s19 = int_to_ptr.vmem [resolvable:$true] %s24_s19 }
   0x3   :  { %p305_p1 = scmp.lt.u32.totalorder %s301_s22, %s429_s3 }
   0x5   :  { %p307_p2 = pnand %p305_p1, %p302_p0 }
   0x7   :  { %310 = shalt.err (!%p307_p2)
}
   0x8   :  { %s311_s27 = scalar_lea.vmem %s25_s19, 512  ;;  %p316_p4 = scmp.lt.s32.totalorder %s25_s19, %s25_s19 }
   0x9   :  { %p312_p3 = scmp.ne.s32.totalorder %s25_s19, %s311_s27  ;;  %p317_p5 = scmp.lt.s32.totalorder %s311_s27, %s311_s27 }
   0xb   :  { %p318_p6 = por %p317_p5, %p316_p4 }
   0xd   :  { %p319_p7 = pnand %p318_p6, %p312_p3 }
   0xf   :  { %322 = shalt.err (!%p319_p7)
}
  0x10   :  { %s350_s28 = smov 128   ;;  %s351_s29 = smov 8  }
  0x11   :  { %30 = dma.hbm_to_vmem [thread:$0]  %s429_s3, 512, %s25_s19, [#allocation4], %s350_s28, %s350_s28, %s351_s29  }
  0x12   :  { %345 = dma.done.wait [#allocation4], 512  }
  0x13   :  { %346 = vsyncadd [#allocation4], 4294966784  ;;  %v352_v0 = vmov 0.0|0.0   ;;  %vm353_vm0 = vmmov 0   ;;  %v354_v1 = vmov 0.0   ;;  %v37_v2 = vld [vmem:[#allocation3] sm:$0xff]  ;;  %v227_v43 = vstv %s430_s4 }
  0x14   :  { %278 = vmatprep.subr.bf16.mxu0 %v352_v0  ;;  %270 = vmatprep.mubr.msk.f32.mxu0 %vm353_vm0, %v354_v1  ;;  %v38_v3 = vld [vmem:[#allocation3 + $0x8] sm:$0xff]  ;;  %v39_v4 = vld [vmem:[#allocation3 + $0x10] sm:$0xff]  ;;  %v40_v6 = vld [vmem:[#allocation3 + $0x18] sm:$0xff]  ;;  %vm41_vm1 = vcmask 261120   ;;  %v355_v10 = vmov 0   ;;  %vm192_vm2 = vcmask 64512  }
  0x15   :  { %273 = vmatprep.subr.mxu1 %v354_v1  ;;  %275 = vmatprep.mubr.msk.f32.mxu1 %vm353_vm0, %v354_v1  ;;  %v279_v5 = vpack.c.bf16 %v38_v3, %v37_v2  ;;  %v282_v7 = vpack.c.bf16 %v40_v6, %v39_v4  ;;  %v36_v8 = vld [vmem:[%s426_s0] sm:$0xff]  ;;  %vm235_vm3 = vcmask 57344  }
  0x16   :  { %v210_v9 = vld [vmem:[%s428_s2] sm:$0xff]  ;;  %292 = vset.pattern.permute.xlu0 %v355_v10  ;;  %s356_s2 = smov [#allocation6]  }
  0x17   :  { %280 = vmatpush3.bf16.msra.mxu0 %v279_v5  ;;  %213 = vperm.xlu0 %292, %v210_v9   ;;  %v115_v13 = vld [vmem:[%s427_s1] sm:$0xff]  ;;  %s243_s12 = sshll.u32 %s356_s2, 4  ;;  %s244_s12 = int_to_ptr.vmem [resolvable:$true] %s243_s12 }
  0x18   :  { %281 = vmatprep.subr.bf16.mxu0 %v352_v0  ;;  %s323_s13 = scalar_lea.vmem %s244_s12, 16  ;;  %s327_s14 = scalar_lea.vmem %s244_s12, 32 }
  0x19   :  { %p324_p8 = scmp.ne.s32.totalorder %s244_s12, %s323_s13  ;;  %p328_p9 = scmp.lt.s32.totalorder %s244_s12, %s244_s12 }
  0x1a   :  { %p329_p10 = scmp.lt.s32.totalorder %s327_s14, %s323_s13 }
  0x1b   :  { %283 = vmatpush3.bf16.msra.mxu0 %v282_v7 }
  0x1c   :  { %p330_p11 = por %p329_p10, %p328_p9 }
  0x1e   :  { %271 = vmatmul.mubr.msk.f32.vlgmr.msra.gmra.mrb[0].mxu0 %vm41_vm1, %v36_v8  ;;  %p331_p12 = pnand %p330_p11, %p324_p8 }
  0x96   :  { %v214_v25 = vpop.permute.xlu0 %213 }
  0xf1   :  { %v111_v11 = vpop.f32.mrb[0].mxu0 }
  0xf2   :  { %v272_v12 = vpop.f32.mrb[1].mxu0  ;;  %274 = vmatpush3.xpose.msk.msra.mxu1 %vm41_vm1, %v111_v11 }
  0xf5   :  { %276 = vmatmul.mubr.msk.f32.vlgmr.msra.gmra.mrb[0].mxu1 %vm41_vm1, %v115_v13 }
 0x1c8   :  { %v188_v14 = vpop.f32.mrb[0].mxu1 }
 0x1c9   :  { %v193_v15 = vsel %vm192_vm2, %v188_v14, -inf  ;;  %v277_v16 = vpop.f32.mrb[1].mxu1 }
 0x1ca   :  { %v194_v17 = vrot.slane %v193_v15, 4 }
 0x1cc   :  { %v195_v18 = vmax.f32 %v193_v15, %v194_v17 }
 0x1ce   :  { %v196_v19 = vrot.slane %v195_v18, 2 }
 0x1d0   :  { %v197_v20 = vmax.f32 %v195_v18, %v196_v19 }
 0x1d2   :  { %v198_v21 = vrot.slane %v197_v20, 1 }
 0x1d4   :  { %v199_v22 = vmax.f32 %v197_v20, %v198_v21 }
 0x1d6   :  { %v200_v23 = vsub.f32 %v188_v14, %v199_v22 }
 0x1d8   :  { %v201_v24 = vmul.f32 1.442695, %v200_v23 }
 0x1da   :  { %293 = vpow2.f32 %v201_v24 }
 0x1e4   :  { %v294_v26 = vpop.eup %293 }
 0x1e5   :  { %v203_v27 = vsel %vm192_vm2, %v294_v26, 0.0  ;;  %v216_v28 = vmul.f32 %v294_v26, %v214_v25 }
 0x1e6   :  { %v204_v29 = vrot.slane %v203_v27, 4 }
 0x1e7   :  { %v217_v30 = vsel %vm192_vm2, %v216_v28, 0.0 }
 0x1e8   :  { %v205_v31 = vadd.f32 %v204_v29, %v203_v27  ;;  %v218_v32 = vrot.slane %v217_v30, 4 }
 0x1ea   :  { %v206_v33 = vrot.slane %v205_v31, 2  ;;  %v219_v34 = vadd.f32 %v218_v32, %v217_v30 }
 0x1ec   :  { %v207_v35 = vadd.f32 %v206_v33, %v205_v31  ;;  %v220_v37 = vrot.slane %v219_v34, 2 }
 0x1ee   :  { %v208_v36 = vrot.slane %v207_v35, 1  ;;  %v221_v39 = vadd.f32 %v220_v37, %v219_v34 }
 0x1f0   :  { %v209_v38 = vadd.f32 %v208_v36, %v207_v35  ;;  %v222_v40 = vrot.slane %v221_v39, 1 }
 0x1f2   :  { %295 = vrcp.f32 %v209_v38  ;;  %v223_v41 = vadd.f32 %v222_v40, %v221_v39 }
 0x1fc   :  { %v296_v42 = vpop.eup %295 }
 0x1fd   :  { %v225_v44 = vmul.f32 %v296_v42, %v223_v41 }
 0x1ff   :  { %v228_v45 = vadd.f32 %v227_v43, %v225_v44 }
 0x201   :  { %v229_v46 = vsub.f32 0.0, %v228_v45 }
 0x203   :  { %v230_v47 = vmul.f32 1.442695, %v229_v46 }
 0x205   :  { %297 = vpow2.f32 %v230_v47 }
 0x20f   :  { %v298_v48 = vpop.eup %297 }
 0x210   :  { %v232_v49 = vadd.f32 1.0, %v298_v48 }
 0x212   :  { %299 = vrcp.f32 %v232_v49 }
 0x21c   :  { %v300_v50 = vpop.eup %299 }
 0x21d   :  { %236 = vst.msk [vmem:[#allocation6] sm:$0x1] %vm235_vm3, %v300_v50 }
 0x21e   :  { %334 = shalt.err (!%p331_p12)
}
 0x21f   :  { %s335_s16 = scalar_lea.hbm %s431_s5, 16 }
 0x220   :  { %p336_p13 = scmp.ne.s32.totalorder %s431_s5, %s335_s16  ;;  %p339_p0 = scmp.lt.u32.totalorder %s335_s16, %s431_s5 }
 0x222   :  { %p341_p1 = pnand %p339_p0, %p336_p13 }
 0x224   :  { %344 = shalt.err (!%p341_p1)
}
 0x225   :  { %246 = dma.vmem_to_hbm [thread:$0]  %s244_s12, 16, %s431_s5, [#allocation5]  }
 0x226   :  { %347 = dma.done.wait [#allocation5], 16  }
 0x227   :  { %348 = vsyncadd [#allocation5], 4294967280 }
 0x228   :  { %250 = vsyncpa [#allocation4], 1 }
 0x229   :  { %251 = vsyncpa [#allocation5], 1 }

// kernel: tpu_custom_call.1
= control target key start
LH: loop header
LB: loop body
LE: loop exit
PB: predicated region body
PF: predicated region fallthrough
CT: control target
= control target key end

     0   :  { %11 = vsyncpa [#allocation4], 0  ;;  %s426_s0 = inlined_call_operand.vmem [shape: f32[8,32], index: 0, kind: input, shape index: {}]   ;;  %s427_s1 = inlined_call_operand.vmem [shape: f32[8,32], index: 1, kind: input, shape index: {}]   ;;  %s428_s2 = inlined_call_operand.vmem [shape: f32[8,1], index: 2, kind: input, shape index: {}]   ;;  %s429_s3 = inlined_call_operand.hbm [shape: f32[32,32], index: 3, kind: input, shape index: {}]   ;;  %s430_s4 = inlined_call_operand.<no memory space> [shape: f32[1], index: 4, kind: input, shape index: {}]   ;;  %s431_s5 = inlined_call_operand.hbm [shape: f32[1,8], index: 5, kind: output, shape index: {}]  }
   0x1   :  { %12 = vsyncpa [#allocation5], 0  ;;  %s349_s18 = smov [#allocation3]   ;;  %s301_s22 = scalar_lea.hbm %s429_s3, 512 }
   0x2   :  { %s24_s19 = sshll.u32 %s349_s18, 4  ;;  %p302_p0 = scmp.ne.s32.totalorder %s429_s3, %s301_s22  ;;  %s25_s19 = int_to_ptr.vmem [resolvable:$true] %s24_s19 }
   0x3   :  { %p305_p1 = scmp.lt.u32.totalorder %s301_s22, %s429_s3 }
   0x5   :  { %p307_p2 = pnand %p305_p1, %p302_p0 }
   0x7   :  { %310 = shalt.err (!%p307_p2)
}
   0x8   :  { %s311_s27 = scalar_lea.vmem %s25_s19, 512  ;;  %p316_p4 = scmp.lt.s32.totalorder %s25_s19, %s25_s19 }
   0x9   :  { %p312_p3 = scmp.ne.s32.totalorder %s25_s19, %s311_s27  ;;  %p317_p5 = scmp.lt.s32.totalorder %s311_s27, %s311_s27 }
   0xb   :  { %p318_p6 = por %p317_p5, %p316_p4 }
   0xd   :  { %p319_p7 = pnand %p318_p6, %p312_p3 }
   0xf   :  { %322 = shalt.err (!%p319_p7)
}
  0x10   :  { %s350_s28 = smov 128   ;;  %s351_s29 = smov 8  }
  0x11   :  { %30 = dma.hbm_to_vmem [thread:$0]  %s429_s3, 512, %s25_s19, [#allocation4], %s350_s28, %s350_s28, %s351_s29  }
  0x12   :  { %345 = dma.done.wait [#allocation4], 512  }
  0x13   :  { %346 = vsyncadd [#allocation4], 4294966784  ;;  %v352_v0 = vmov 0.0|0.0   ;;  %vm353_vm0 = vmmov 0   ;;  %v354_v1 = vmov 0.0   ;;  %v37_v2 = vld [vmem:[#allocation3] sm:$0xff]  ;;  %v227_v43 = vstv %s430_s4 }
  0x14   :  { %278 = vmatprep.subr.bf16.mxu0 %v352_v0  ;;  %270 = vmatprep.mubr.msk.f32.mxu0 %vm353_vm0, %v354_v1  ;;  %v38_v3 = vld [vmem:[#allocation3 + $0x8] sm:$0xff]  ;;  %v39_v4 = vld [vmem:[#allocation3 + $0x10] sm:$0xff]  ;;  %v40_v6 = vld [vmem:[#allocation3 + $0x18] sm:$0xff]  ;;  %vm41_vm1 = vcmask 261120   ;;  %v355_v10 = vmov 0   ;;  %vm192_vm2 = vcmask 64512  }
  0x15   :  { %273 = vmatprep.subr.mxu1 %v354_v1  ;;  %275 = vmatprep.mubr.msk.f32.mxu1 %vm353_vm0, %v354_v1  ;;  %v279_v5 = vpack.c.bf16 %v38_v3, %v37_v2  ;;  %v282_v7 = vpack.c.bf16 %v40_v6, %v39_v4  ;;  %v36_v8 = vld [vmem:[%s426_s0] sm:$0xff]  ;;  %vm235_vm3 = vcmask 57344  }
  0x16   :  { %v210_v9 = vld [vmem:[%s428_s2] sm:$0xff]  ;;  %292 = vset.pattern.permute.xlu0 %v355_v10  ;;  %s356_s2 = smov [#allocation6]  }
  0x17   :  { %280 = vmatpush3.bf16.msra.mxu0 %v279_v5  ;;  %213 = vperm.xlu0 %292, %v210_v9   ;;  %v115_v13 = vld [vmem:[%s427_s1] sm:$0xff]  ;;  %s243_s12 = sshll.u32 %s356_s2, 4  ;;  %s244_s12 = int_to_ptr.vmem [resolvable:$true] %s243_s12 }
  0x18   :  { %281 = vmatprep.subr.bf16.mxu0 %v352_v0  ;;  %s323_s13 = scalar_lea.vmem %s244_s12, 16  ;;  %s327_s14 = scalar_lea.vmem %s244_s12, 32 }
  0x19   :  { %p324_p8 = scmp.ne.s32.totalorder %s244_s12, %s323_s13  ;;  %p328_p9 = scmp.lt.s32.totalorder %s244_s12, %s244_s12 }
  0x1a   :  { %p329_p10 = scmp.lt.s32.totalorder %s327_s14, %s323_s13 }
  0x1b   :  { %283 = vmatpush3.bf16.msra.mxu0 %v282_v7 }
  0x1c   :  { %p330_p11 = por %p329_p10, %p328_p9 }
  0x1e   :  { %271 = vmatmul.mubr.msk.f32.vlgmr.msra.gmra.mrb[0].mxu0 %vm41_vm1, %v36_v8  ;;  %p331_p12 = pnand %p330_p11, %p324_p8 }
  0x96   :  { %v214_v25 = vpop.permute.xlu0 %213 }
  0xf1   :  { %v111_v11 = vpop.f32.mrb[0].mxu0 }
  0xf2   :  { %v272_v12 = vpop.f32.mrb[1].mxu0  ;;  %274 = vmatpush3.xpose.msk.msra.mxu1 %vm41_vm1, %v111_v11 }
  0xf5   :  { %276 = vmatmul.mubr.msk.f32.vlgmr.msra.gmra.mrb[0].mxu1 %vm41_vm1, %v115_v13 }
 0x1c8   :  { %v188_v14 = vpop.f32.mrb[0].mxu1 }
 0x1c9   :  { %v193_v15 = vsel %vm192_vm2, %v188_v14, -inf  ;;  %v277_v16 = vpop.f32.mrb[1].mxu1 }
 0x1ca   :  { %v194_v17 = vrot.slane %v193_v15, 4 }
 0x1cc   :  { %v195_v18 = vmax.f32 %v193_v15, %v194_v17 }
 0x1ce   :  { %v196_v19 = vrot.slane %v195_v18, 2 }
 0x1d0   :  { %v197_v20 = vmax.f32 %v195_v18, %v196_v19 }
 0x1d2   :  { %v198_v21 = vrot.slane %v197_v20, 1 }
 0x1d4   :  { %v199_v22 = vmax.f32 %v197_v20, %v198_v21 }
 0x1d6   :  { %v200_v23 = vsub.f32 %v188_v14, %v199_v22 }
 0x1d8   :  { %v201_v24 = vmul.f32 1.442695, %v200_v23 }
 0x1da   :  { %293 = vpow2.f32 %v201_v24 }
 0x1e4   :  { %v294_v26 = vpop.eup %293 }
 0x1e5   :  { %v203_v27 = vsel %vm192_vm2, %v294_v26, 0.0  ;;  %v216_v28 = vmul.f32 %v294_v26, %v214_v25 }
 0x1e6   :  { %v204_v29 = vrot.slane %v203_v27, 4 }
 0x1e7   :  { %v217_v30 = vsel %vm192_vm2, %v216_v28, 0.0 }
 0x1e8   :  { %v205_v31 = vadd.f32 %v204_v29, %v203_v27  ;;  %v218_v32 = vrot.slane %v217_v30, 4 }
 0x1ea   :  { %v206_v33 = vrot.slane %v205_v31, 2  ;;  %v219_v34 = vadd.f32 %v218_v32, %v217_v30 }
 0x1ec   :  { %v207_v35 = vadd.f32 %v206_v33, %v205_v31  ;;  %v220_v37 = vrot.slane %v219_v34, 2 }
 0x1ee   :  { %v208_v36 = vrot.slane %v207_v35, 1  ;;  %v221_v39 = vadd.f32 %v220_v37, %v219_v34 }
 0x1f0   :  { %v209_v38 = vadd.f32 %v208_v36, %v207_v35  ;;  %v222_v40 = vrot.slane %v221_v39, 1 }
 0x1f2   :  { %295 = vrcp.f32 %v209_v38  ;;  %v223_v41 = vadd.f32 %v222_v40, %v221_v39 }
 0x1fc   :  { %v296_v42 = vpop.eup %295 }
 0x1fd   :  { %v225_v44 = vmul.f32 %v296_v42, %v223_v41 }
 0x1ff   :  { %v228_v45 = vadd.f32 %v227_v43, %v225_v44 }
 0x201   :  { %v229_v46 = vsub.f32 0.0, %v228_v45 }
 0x203   :  { %v230_v47 = vmul.f32 1.442695, %v229_v46 }
 0x205   :  { %297 = vpow2.f32 %v230_v47 }
 0x20f   :  { %v298_v48 = vpop.eup %297 }
 0x210   :  { %v232_v49 = vadd.f32 1.0, %v298_v48 }
 0x212   :  { %299 = vrcp.f32 %v232_v49 }
 0x21c   :  { %v300_v50 = vpop.eup %299 }
 0x21d   :  { %236 = vst.msk [vmem:[#allocation6] sm:$0x1] %vm235_vm3, %v300_v50 }
 0x21e   :  { %334 = shalt.err (!%p331_p12)
}
 0x21f   :  { %s335_s16 = scalar_lea.hbm %s431_s5, 16 }
 0x220   :  { %p336_p13 = scmp.ne.s32.totalorder %s431_s5, %s335_s16  ;;  %p339_p0 = scmp.lt.u32.totalorder %s335_s16, %s431_s5 }
 0x222   :  { %p341_p1 = pnand %p339_p0, %p336_p13 }
 0x224   :  { %344 = shalt.err (!%p341_p1)
}
 0x225   :  { %246 = dma.vmem_to_hbm [thread:$0]  %s244_s12, 16, %s431_s5, [#allocation5]  }
 0x226   :  { %347 = dma.done.wait [#allocation5], 16  }
 0x227   :  { %348 = vsyncadd [#allocation5], 4294967280 }
 0x228   :  { %250 = vsyncpa [#allocation4], 1 }
 0x229   :  { %251 = vsyncpa [#allocation5], 1 }

</bundles_post_ra>
